<compile_context>
chip_gen: v6e
topology: v6e:2x2x1
jax: 0.10.0
libtpu: 0.0.40
codegen_flags: <defaults>
</compile_context>

<pallas_src>
import functools

import jax
import jax.numpy as jnp
from jax.experimental import pallas as pl
from jax.experimental.pallas import tpu as pltpu

LANE = 128
VMEM_LIMIT_AGG = 48 * 1024 * 1024
VMEM_LIMIT_LIN = 32 * 1024 * 1024
XWL_RESIDENT_BYTES = 4 * 1024 * 1024  # keep XWl resident if one copy <= 4 MiB


def _round_up(x, m):
    return ((x + m - 1) // m) * m


def _pick_tile(n_pad, max_tile):
    """Largest tile <= max_tile that divides n_pad (n_pad is a multiple of 512)."""
    t = min(max_tile, n_pad)
    while n_pad % t != 0:
        t //= 2
    return t


# ---------------------------------------------------------------------------
# Kernel 1: layer-1 per-node linear transforms (fused W_l|W_r matmul).
#   y     = X @ [W_l | W_r]            (one 2*width-wide MXU matmul)
#   xwl   = y[:, :width]               (neighbor path, bf16)
#   xself = y[:, width:] + b           (root/self path + bias, f32)
# ---------------------------------------------------------------------------
def sage_linear_kernel(x_ref, wcat_ref, b_ref, xwl_ref, xself_ref, *, width):
    y = jnp.dot(x_ref[...], wcat_ref[...], preferred_element_type=jnp.float32)
    xwl_ref[...] = y[:, :width].astype(xwl_ref.dtype)
    xself_ref[...] = (y[:, width:] + b_ref[...]).astype(xself_ref.dtype)


def sage_linear(x_bf16, wcat, b, *, block_m, width):
    n_pad, fin_pad = x_bf16.shape
    kernel = functools.partial(sage_linear_kernel, width=width)
    return pl.pallas_call(
        kernel,
        out_shape=(
            jax.ShapeDtypeStruct((n_pad, width), jnp.bfloat16),   # X @ W_l
            jax.ShapeDtypeStruct((n_pad, width), jnp.float32),    # X @ W_r + b
        ),
        grid=(n_pad // block_m,),
        in_specs=[
            pl.BlockSpec((block_m, fin_pad), lambda i: (i, 0)),
            pl.BlockSpec((fin_pad, 2 * width), lambda i: (0, 0)),
            pl.BlockSpec((1, width), lambda i: (0, 0)),
        ],
        out_specs=(
            pl.BlockSpec((block_m, width), lambda i: (i, 0)),
            pl.BlockSpec((block_m, width), lambda i: (i, 0)),
        ),
        compiler_params=pltpu.CompilerParams(
            dimension_semantics=("parallel",),
            vmem_limit_bytes=VMEM_LIMIT_LIN,
        ),
    )(x_bf16, wcat, b)


# ---------------------------------------------------------------------------
# Kernel 2: layer-1 aggregation + relu fused with the layer-2 per-node linear.
#   acc   += A_counts @ XWl1                      (reduction over k tiles)
#   h1     = relu(acc * inv_deg + XSelf1)         (finalize, f32)
#   y2     = h1 @ [Wl2 | Wr2]                     (layer-2 linear, rides on tile)
#   XWl2   = y2[:, :out_w]   (bf16)    XSelf2 = y2[:, out_w:] + b2   (f32)
# ---------------------------------------------------------------------------
def sage_agg_mid_kernel(a_ref, xwl_ref, invdeg_ref, xself_ref, wcat2_ref, b2_ref,
                        xwl2_ref, xself2_ref, acc_ref, *,
                        block_k, out_width, xwl_resident):
    k = pl.program_id(1)

    @pl.when(k == 0)
    def _init():
        acc_ref[...] = jnp.zeros_like(acc_ref)

    if xwl_resident:
        off = pl.multiple_of(k * block_k, block_k)
        xwl = xwl_ref[pl.ds(off, block_k), :]
    else:
        xwl = xwl_ref[...]
    acc_ref[...] += jnp.dot(a_ref[...], xwl, preferred_element_type=jnp.float32)

    @pl.when(k == pl.num_programs(1) - 1)
    def _finalize():
        h1 = jnp.maximum(acc_ref[...] * invdeg_ref[...] + xself_ref[...], 0.0)
        y2 = jnp.dot(h1.astype(jnp.bfloat16), wcat2_ref[...],
                     preferred_element_type=jnp.float32)
        xwl2_ref[...] = y2[:, :out_width].astype(xwl2_ref.dtype)
        xself2_ref[...] = (y2[:, out_width:] + b2_ref[...]).astype(xself2_ref.dtype)


def sage_agg_mid(a, xwl1, invdeg, xself1, wcat2, b2, *,
                 block_m, block_k, out_width, xwl_resident):
    n_pad = a.shape[0]
    hid_width = xwl1.shape[1]
    kernel = functools.partial(sage_agg_mid_kernel, block_k=block_k,
                               out_width=out_width, xwl_resident=xwl_resident)
    xwl_spec = (pl.BlockSpec((n_pad, hid_width), lambda i, k: (0, 0))
                if xwl_resident
                else pl.BlockSpec((block_k, hid_width), lambda i, k: (k, 0)))
    cost = pl.CostEstimate(
        flops=2 * n_pad * n_pad * hid_width
              + 2 * n_pad * hid_width * 2 * out_width,
        transcendentals=0,
        bytes_accessed=(a.size * 2 + xwl1.size * 2 + xself1.size * 4
                        + invdeg.size * 4 + wcat2.size * 2
                        + n_pad * out_width * (2 + 4)),
    )
    return pl.pallas_call(
        kernel,
        out_shape=(
            jax.ShapeDtypeStruct((n_pad, out_width), jnp.bfloat16),   # XWl2
            jax.ShapeDtypeStruct((n_pad, out_width), jnp.float32),    # XSelf2
        ),
        grid=(n_pad // block_m, n_pad // block_k),
        in_specs=[
            pl.BlockSpec((block_m, block_k), lambda i, k: (i, k)),
            xwl_spec,
            pl.BlockSpec((block_m, 1), lambda i, k: (i, 0)),
            pl.BlockSpec((block_m, hid_width), lambda i, k: (i, 0)),
            pl.BlockSpec((hid_width, 2 * out_width), lambda i, k: (0, 0)),
            pl.BlockSpec((1, out_width), lambda i, k: (0, 0)),
        ],
        out_specs=(
            pl.BlockSpec((block_m, out_width), lambda i, k: (i, 0)),
            pl.BlockSpec((block_m, out_width), lambda i, k: (i, 0)),
        ),
        scratch_shapes=[pltpu.VMEM((block_m, hid_width), jnp.float32)],
        compiler_params=pltpu.CompilerParams(
            dimension_semantics=("parallel", "arbitrary"),
            vmem_limit_bytes=VMEM_LIMIT_AGG,
        ),
        cost_estimate=cost,
    )(a, xwl1, invdeg, xself1, wcat2, b2)


# ---------------------------------------------------------------------------
# Kernel 3: layer-2 aggregation + masked log_softmax.
#   out  += A_counts @ XWl2          (accumulated directly in the f32 out block)
#   h     = out * inv_deg + XSelf2
#   out   = log_softmax(h) over the first `valid_cols` columns
# ---------------------------------------------------------------------------
def sage_agg_out_kernel(a_ref, xwl_ref, invdeg_ref, xself_ref, out_ref, *,
                        block_k, valid_cols, xwl_resident):
    k = pl.program_id(1)

    @pl.when(k == 0)
    def _init():
        out_ref[...] = jnp.zeros_like(out_ref)

    if xwl_resident:
        off = pl.multiple_of(k * block_k, block_k)
        xwl = xwl_ref[pl.ds(off, block_k), :]
    else:
        xwl = xwl_ref[...]
    out_ref[...] += jnp.dot(a_ref[...], xwl, preferred_element_type=jnp.float32)

    @pl.when(k == pl.num_programs(1) - 1)
    def _finalize():
        h = out_ref[...] * invdeg_ref[...] + xself_ref[...]
        col = jax.lax.broadcasted_iota(jnp.int32, h.shape, 1)
        h = jnp.where(col < valid_cols, h, jnp.float32(-1e30))
        m = jnp.max(h, axis=-1, keepdims=True)
        z = h - m
        lse = jnp.log(jnp.sum(jnp.exp(z), axis=-1, keepdims=True))
        out_ref[...] = z - lse


def sage_agg_out(a, xwl2, invdeg, xself2, *, block_m, block_k, valid_cols,
                 xwl_resident):
    n_pad = a.shape[0]
    width = xwl2.shape[1]
    kernel = functools.partial(sage_agg_out_kernel, block_k=block_k,
                               valid_cols=valid_cols, xwl_resident=xwl_resident)
    xwl_spec = (pl.BlockSpec((n_pad, width), lambda i, k: (0, 0))
                if xwl_resident
                else pl.BlockSpec((block_k, width), lambda i, k: (k, 0)))
    cost = pl.CostEstimate(
        flops=2 * n_pad * n_pad * width + 4 * n_pad * width,
        transcendentals=n_pad * width,
        bytes_accessed=(a.size * 2 + xwl2.size * 2 + xself2.size * 4
                        + invdeg.size * 4 + n_pad * width * 4),
    )
    return pl.pallas_call(
        kernel,
        out_shape=jax.ShapeDtypeStruct((n_pad, width), jnp.float32),
        grid=(n_pad // block_m, n_pad // block_k),
        in_specs=[
            pl.BlockSpec((block_m, block_k), lambda i, k: (i, k)),
            xwl_spec,
            pl.BlockSpec((block_m, 1), lambda i, k: (i, 0)),
            pl.BlockSpec((block_m, width), lambda i, k: (i, 0)),
        ],
        out_specs=pl.BlockSpec((block_m, width), lambda i, k: (i, 0)),
        compiler_params=pltpu.CompilerParams(
            dimension_semantics=("parallel", "arbitrary"),
            vmem_limit_bytes=VMEM_LIMIT_AGG,
        ),
        cost_estimate=cost,
    )(a, xwl2, invdeg, xself2)


# ---------------------------------------------------------------------------
# Graph glue + forward wrapper
# ---------------------------------------------------------------------------
def build_adj(edge_index, num_nodes):
    """Exact edge-count adjacency A[i,j] = #edges j->i and per-row 1/deg (f32)."""
    src = edge_index[0]
    dst = edge_index[1]
    a = jnp.zeros((num_nodes, num_nodes), jnp.float32)
    a = a.at[dst, src].add(1.0)
    deg = jnp.sum(a, axis=1, keepdims=True)
    inv_deg = 1.0 / jnp.maximum(deg, 1.0)
    return a, inv_deg


def graphsage_forward(x, edge_index, params, *, block_m=1024, block_k=2048):
    n, fin = x.shape
    hidden = params["wl1"].shape[1]
    out_channels = params["wl2"].shape[1]

    # ---- pad once to a tile-friendly size; tiles are divisors of n_pad -----
    fin_pad = _round_up(fin, LANE)
    hid_pad = _round_up(hidden, LANE)
    out_pad = _round_up(out_channels, LANE)

    if n <= 512:
        n_pad = _round_up(n, LANE)
        tm = tk = n_pad
    else:
        n_pad = _round_up(n, 512)
        tm = _pick_tile(n_pad, block_m)
        tk = _pick_tile(n_pad, block_k)

    xwl1_resident = n_pad * hid_pad * 2 <= XWL_RESIDENT_BYTES
    xwl2_resident = n_pad * out_pad * 2 <= XWL_RESIDENT_BYTES

    def pad2(arr, rows, cols):
        return jnp.pad(arr, ((0, rows - arr.shape[0]), (0, cols - arr.shape[1])))

    adj, inv_deg = build_adj(edge_index, n)
    adj_p = pad2(adj, n_pad, n_pad).astype(jnp.bfloat16)       # integer counts: exact in bf16
    invdeg_p = pad2(inv_deg, n_pad, 1).astype(jnp.float32)     # padded rows -> 0
    x_p = pad2(x, n_pad, fin_pad).astype(jnp.bfloat16)

    wcat1 = jnp.concatenate(
        [pad2(params["wl1"], fin_pad, hid_pad), pad2(params["wr1"], fin_pad, hid_pad)],
        axis=1).astype(jnp.bfloat16)
    b1 = pad2(params["bl1"], 1, hid_pad).astype(jnp.float32)
    wcat2 = jnp.concatenate(
        [pad2(params["wl2"], hid_pad, out_pad), pad2(params["wr2"], hid_pad, out_pad)],
        axis=1).astype(jnp.bfloat16)
    b2 = pad2(params["bl2"], 1, out_pad).astype(jnp.float32)

    # ---- layer 1 per-node linear: XWl1, XSelf1 -----------------------------
    xwl1, xself1 = sage_linear(x_p, wcat1, b1, block_m=tm, width=hid_pad)

    # ---- layer 1 aggregation + relu, fused with layer-2 linear -------------
    # dropout(p=0.5, training=False) -> identity (eval mode)
    # TODO(synk): training-mode path (dropout mask, nll_loss on the first
    # batch_size nodes) not exercised; module implemented in eval mode.
    xwl2, xself2 = sage_agg_mid(adj_p, xwl1, invdeg_p, xself1, wcat2, b2,
                                block_m=tm, block_k=tk, out_width=out_pad,
                                xwl_resident=xwl1_resident)

    # ---- layer 2 aggregation + log_softmax ----------------------------------
    out = sage_agg_out(adj_p, xwl2, invdeg_p, xself2,
                       block_m=tm, block_k=tk, valid_cols=out_channels,
                       xwl_resident=xwl2_resident)

    return out[:n, :out_channels]


def init_params(key, in_channels, hidden, out_channels):
    """Deterministic synthetic init (torch.manual_seed(1234) stand-in)."""
    ks = jax.random.split(key, 6)
    s1 = 1.0 / jnp.sqrt(in_channels)
    s2 = 1.0 / jnp.sqrt(hidden)
    return {
        # layer 1: SAGEConv(in_channels, 64)
        "wl1": jax.random.uniform(ks[0], (in_channels, hidden), jnp.float32, -s1, s1),
        "bl1": jax.random.uniform(ks[1], (1, hidden), jnp.float32, -s1, s1),
        "wr1": jax.random.uniform(ks[2], (in_channels, hidden), jnp.float32, -s1, s1),
        # layer 2: SAGEConv(64, out_channels)
        "wl2": jax.random.uniform(ks[3], (hidden, out_channels), jnp.float32, -s2, s2),
        "bl2": jax.random.uniform(ks[4], (1, out_channels), jnp.float32, -s2, s2),
        "wr2": jax.random.uniform(ks[5], (hidden, out_channels), jnp.float32, -s2, s2),
    }


def reference_forward(x, edge_index, params):
    """Pure-JAX f32 reference of the same forward pass."""
    a, inv_deg = build_adj(edge_index, x.shape[0])
    a = a * inv_deg
    h1 = jnp.maximum(a @ (x @ params["wl1"]) + params["bl1"]
                     + x @ params["wr1"], 0.0)
    h2 = a @ (h1 @ params["wl2"]) + params["bl2"] + h1 @ params["wr2"]
    return jax.nn.log_softmax(h2, axis=-1)


if __name__ == "__main__":
    num_nodes = 16
    in_channels = 16
    hidden = 64
    out_channels = 8
    num_edges = 40

    key = jax.random.PRNGKey(0)
    k_x, k_e, k_p = jax.random.split(key, 3)

    x = jax.random.normal(k_x, (num_nodes, in_channels), jnp.float32)
    edge_index = jax.random.randint(k_e, (2, num_edges), 0, num_nodes, jnp.int32)
    params = init_params(k_p, in_channels, hidden, out_channels)

    out = graphsage_forward(x, edge_index, params)
    out = jax.block_until_ready(out)

    assert out.shape == (num_nodes, out_channels)
    # log_softmax rows sum to ~1 in prob space (f32 epilogue -> tight)
    assert jnp.allclose(jnp.sum(jnp.exp(out), axis=-1), 1.0, atol=1e-4)
    # matches the f32 reference up to bf16 input quantization
    ref = reference_forward(x, edge_index, params)
    assert float(jnp.max(jnp.abs(out - ref))) < 0.2
    print("KERNEL_OK")
</pallas_src>

<mosaic_0001>
module attributes {stable_mosaic.version = 11 : i64} {
  func.func @sage_linear_kernel(%arg0: i32, %arg1: memref<128x128xbf16, #tpu.memory_space<vmem>>, %arg2: memref<128x256xbf16, #tpu.memory_space<vmem>>, %arg3: memref<1x128xf32, #tpu.memory_space<vmem>>, %arg4: memref<128x128xbf16, #tpu.memory_space<vmem>>, %arg5: memref<128x128xf32, #tpu.memory_space<vmem>>) attributes {dimension_semantics = [#tpu.dimension_semantics<parallel>], iteration_bounds = array<i64: 1>, scalar_prefetch = 0 : i64, scratch_operands = 0 : i64, tpu.core_type = #tpu.core_type<tc>, window_params = [{transform_indices = @transform_0, window_bounds = array<i64: 128, 128>}, {pipeline_mode = #tpu.pipeline_mode<synchronous>, transform_indices = @transform_1, window_bounds = array<i64: 128, 256>}, {pipeline_mode = #tpu.pipeline_mode<synchronous>, transform_indices = @transform_2, window_bounds = array<i64: 1, 128>}, {transform_indices = @transform_3, window_bounds = array<i64: 128, 128>}, {transform_indices = @transform_4, window_bounds = array<i64: 128, 128>}]} {
    %c0 = arith.constant 0 : index
    %c0_0 = arith.constant 0 : index
    %0 = vector.load %arg1[%c0, %c0_0] : memref<128x128xbf16, #tpu.memory_space<vmem>>, vector<128x128xbf16>
    %c0_1 = arith.constant 0 : index
    %c0_2 = arith.constant 0 : index
    %1 = vector.load %arg2[%c0_1, %c0_2] : memref<128x256xbf16, #tpu.memory_space<vmem>>, vector<128x256xbf16>
    %cst = arith.constant dense<0.000000e+00> : vector<128x256xf32>
    %2 = tpu.matmul %0, %1, %cst {dimension_numbers = #tpu.dot_dimension_numbers<[1], [0], [0], [1], [0, 0, 1, 1], [], []>} : vector<128x128xbf16>, vector<128x256xbf16>, vector<128x256xf32> -> vector<128x256xf32>
    %3 = vector.extract_strided_slice %2 {offsets = [0, 0], sizes = [128, 128], strides = [1, 1]} : vector<128x256xf32> to vector<128x128xf32>
    %4 = arith.truncf %3 : vector<128x128xf32> to vector<128x128xbf16>
    %c0_3 = arith.constant 0 : index
    %c0_4 = arith.constant 0 : index
    %5 = vector.load %arg4[%c0_3, %c0_4] : memref<128x128xbf16, #tpu.memory_space<vmem>>, vector<128x128xbf16>
    tpu.vector_store %arg4[%c0_3, %c0_4], %4 {strides = array<i32>} : memref<128x128xbf16, #tpu.memory_space<vmem>>, vector<128x128xbf16>,
    %6 = vector.extract_strided_slice %2 {offsets = [0, 128], sizes = [128, 128], strides = [1, 1]} : vector<128x256xf32> to vector<128x128xf32>
    %c0_5 = arith.constant 0 : index
    %c0_6 = arith.constant 0 : index
    %7 = vector.load %arg3[%c0_5, %c0_6] : memref<1x128xf32, #tpu.memory_space<vmem>>, vector<1x128xf32>
    %8 = vector.broadcast %7 : vector<1x128xf32> to vector<128x128xf32>
    %9 = arith.addf %6, %8 : vector<128x128xf32>
    %c0_7 = arith.constant 0 : index
    %c0_8 = arith.constant 0 : index
    %10 = vector.load %arg5[%c0_7, %c0_8] : memref<128x128xf32, #tpu.memory_space<vmem>>, vector<128x128xf32>
    tpu.vector_store %arg5[%c0_7, %c0_8], %9 {strides = array<i32>} : memref<128x128xf32, #tpu.memory_space<vmem>>, vector<128x128xf32>,
    return
  }
  func.func @transform_0(%arg0: i32) -> (i32, i32) {
    %c0_i32 = arith.constant 0 : i32
    %c0_i32_0 = arith.constant 0 : i32
    return %arg0, %c0_i32 : i32, i32
  }
  func.func @transform_1(%arg0: i32) -> (i32, i32) {
    %c0_i32 = arith.constant 0 : i32
    %c0_i32_0 = arith.constant 0 : i32
    %c0_i32_1 = arith.constant 0 : i32
    return %c0_i32, %c0_i32_0 : i32, i32
  }
  func.func @transform_2(%arg0: i32) -> (i32, i32) {
    %c0_i32 = arith.constant 0 : i32
    %c0_i32_0 = arith.constant 0 : i32
    %c0_i32_1 = arith.constant 0 : i32
    return %c0_i32, %c0_i32_0 : i32, i32
  }
  func.func @transform_3(%arg0: i32) -> (i32, i32) {
    %c0_i32 = arith.constant 0 : i32
    %c0_i32_0 = arith.constant 0 : i32
    return %arg0, %c0_i32 : i32, i32
  }
  func.func @transform_4(%arg0: i32) -> (i32, i32) {
    %c0_i32 = arith.constant 0 : i32
    %c0_i32_0 = arith.constant 0 : i32
    return %arg0, %c0_i32 : i32, i32
  }
}

</mosaic_0001>

<bundles_post_ra>
// kernel: tpu_custom_call.1
= control target key start
LH: loop header
LB: loop body
LE: loop exit
PB: predicated region body
PF: predicated region fallthrough
CT: control target
= control target key end

     0   :  { %10 = vsyncpa [#allocation3], 0  ;;  %s809_s0 = inlined_call_operand.hbm [shape: bf16[128,128], index: 0, kind: input, shape index: {}]   ;;  %s810_s1 = inlined_call_operand.hbm [shape: bf16[128,256], index: 1, kind: input, shape index: {}]   ;;  %s811_s2 = inlined_call_operand.vmem [shape: f32[1,128], index: 2, kind: input, shape index: {}]   ;;  %s812_s3 = inlined_call_operand.hbm [shape: bf16[128,128], index: 3, kind: output, shape index: {0}]   ;;  %s813_s4 = inlined_call_operand.hbm [shape: f32[128,128], index: 4, kind: output, shape index: {1}]  }
   0x1   :  { %11 = vsyncpa [#allocation6], 0 }
   0x2   :  { %12 = vsyncpa [#allocation4], 0 }
   0x3   :  { %13 = vsyncpa [#allocation9], 0  ;;  %s722_s15 = smov [#allocation2]  }
   0x4   :  { %s19_s16 = sshll.u32 %s722_s15, 4  ;;  %s20_s16 = int_to_ptr.vmem [resolvable:$true] %s19_s16 }
   0x5   :  { %s642_s17 = scalar_lea.vmem %s20_s16, 1024  ;;  %p647_p1 = scmp.lt.s32.totalorder %s20_s16, %s20_s16 }
   0x6   :  { %p643_p0 = scmp.ne.s32.totalorder %s20_s16, %s642_s17  ;;  %p648_p2 = scmp.lt.s32.totalorder %s642_s17, %s642_s17 }
   0x8   :  { %p649_p3 = por %p648_p2, %p647_p1 }
   0xa   :  { %p650_p4 = pnand %p649_p3, %p643_p0 }
   0xc   :  { %653 = shalt.err (!%p650_p4)
}
   0xd   :  { %s723_s18 = smov 64   ;;  %s724_s19 = smov 4  }
   0xe   :  { %25 = dma.hbm_to_vmem [thread:$0]  %s809_s0, 1024, %s20_s16, [#allocation3], %s723_s18, %s723_s18, %s724_s19  }
   0xf   :  { %s725_s22 = smov [#allocation5]  }
  0x10   :  { %s31_s23 = sshll.u32 %s725_s22, 4  ;;  %s32_s23 = int_to_ptr.vmem [resolvable:$true] %s31_s23 }
  0x11   :  { %s662_s24 = scalar_lea.vmem %s32_s23, 2048  ;;  %p667_p6 = scmp.lt.s32.totalorder %s32_s23, %s32_s23 }
  0x12   :  { %p663_p5 = scmp.ne.s32.totalorder %s32_s23, %s662_s24  ;;  %p668_p7 = scmp.lt.s32.totalorder %s662_s24, %s662_s24 }
  0x14   :  { %p669_p8 = por %p668_p7, %p667_p6 }
  0x16   :  { %p670_p9 = pnand %p669_p8, %p663_p5 }
  0x18   :  { %673 = shalt.err (!%p670_p9)
}
  0x19   :  { %s726_s25 = smov 128   ;;  %s727_s26 = smov 8  }
  0x1a   :  { %37 = dma.hbm_to_vmem [thread:$0]  %s810_s1, 2048, %s32_s23, [#allocation6], %s726_s25, %s726_s25, %s727_s26  }
  0x1b   :  { %714 = dma.done.wait [#allocation3], 1024  }
  0x1c   :  { %715 = vsyncadd [#allocation3], 4294966272 }
  0x1d   :  { %716 = dma.done.wait [#allocation6], 2048  }
  0x1e   :  { %717 = vsyncadd [#allocation6], 4294965248  ;;  %v728_v0 = vmov 0   ;;  %v602_v1 = vld [vmem:[#allocation5 + $0x74] ss:$8 sps:$4 sm:$0xff]   ;;  %v626_v17 = vld [vmem:[#allocation2] sm:$0xff]  }
  0x1f   :  { %239 = vmatprep.mubr.bf16.mxu0 %v728_v0  ;;  %279 = vmatprep.mubr.bf16.mxu1 %v728_v0  ;;  %v604_v2 = vld [vmem:[#allocation5 + $0x70] ss:$8 sps:$4 sm:$0xff]   ;;  %v605_v3 = vld [vmem:[#allocation5 + $0x64] ss:$8 sps:$4 sm:$0xff]   ;;  %v607_v4 = vld [vmem:[#allocation5 + $0x60] ss:$8 sps:$4 sm:$0xff]  }
  0x20   :  { %207 = vmatprep.subr.bf16.mxu0 %v602_v1  ;;  %577 = vmatprep.subr.bf16.mxu1 %v602_v1  ;;  %v608_v5 = vld [vmem:[#allocation5 + $0x54] ss:$8 sps:$4 sm:$0xff]   ;;  %v610_v6 = vld [vmem:[#allocation5 + $0x50] ss:$8 sps:$4 sm:$0xff]   ;;  %v611_v7 = vld [vmem:[#allocation5 + $0x44] ss:$8 sps:$4 sm:$0xff]  }
  0x21   :  { %208 = vmatpush1.bf16.msra.mxu0 %v604_v2  ;;  %585 = vmatpush1.bf16.msra.mxu1 %v604_v2  ;;  %v613_v8 = vld [vmem:[#allocation5 + $0x40] ss:$8 sps:$4 sm:$0xff]   ;;  %v614_v9 = vld [vmem:[#allocation5 + $0x34] ss:$8 sps:$4 sm:$0xff]   ;;  %v616_v10 = vld [vmem:[#allocation5 + $0x30] ss:$8 sps:$4 sm:$0xff]  }
  0x22   :  { %209 = vmatprep.subr.bf16.mxu0 %v605_v3  ;;  %578 = vmatprep.subr.bf16.mxu1 %v605_v3  ;;  %v617_v11 = vld [vmem:[#allocation5 + $0x24] ss:$8 sps:$4 sm:$0xff]   ;;  %v619_v12 = vld [vmem:[#allocation5 + $0x20] ss:$8 sps:$4 sm:$0xff]   ;;  %v620_v13 = vld [vmem:[#allocation5 + $0x14] ss:$8 sps:$4 sm:$0xff]  }
  0x23   :  { %v622_v14 = vld [vmem:[#allocation5 + $0x10] ss:$8 sps:$4 sm:$0xff]   ;;  %v623_v15 = vld [vmem:[#allocation5 + $0x4] ss:$8 sps:$4 sm:$0xff]   ;;  %v625_v16 = vld [vmem:[#allocation5] ss:$8 sps:$4 sm:$0xff]  }
  0x24   :  { %v627_v18 = vld [vmem:[#allocation2 + $0x20] sm:$0xff]   ;;  %v628_v19 = vld [vmem:[#allocation2 + $0x8] sm:$0xff]   ;;  %v630_v21 = vld [vmem:[#allocation2 + $0x10] sm:$0xff]   ;;  %s730_s30 = smov [#allocation8]  }
  0x25   :  { %210 = vmatpush1.bf16.msra.mxu0 %v607_v4  ;;  %586 = vmatpush1.bf16.msra.mxu1 %v607_v4  ;;  %v629_v20 = vld [vmem:[#allocation2 + $0x28] sm:$0xff]   ;;  %v631_v22 = vld [vmem:[#allocation2 + $0x30] sm:$0xff]   ;;  %v632_v23 = vld [vmem:[#allocation2 + $0x18] sm:$0xff]   ;;  %s456_s5 = sshll.u32 %s730_s30, 4  ;;  %s457_s5 = int_to_ptr.vmem [resolvable:$true] %s456_s5 }
  0x26   :  { %211 = vmatprep.subr.bf16.mxu0 %v608_v5  ;;  %579 = vmatprep.subr.bf16.mxu1 %v608_v5  ;;  %v633_v24 = vld [vmem:[#allocation2 + $0x38] sm:$0xff]   ;;  %v779_v27 = vld [vmem:[%s811_s2] ss:$0 sm:$0xff]  ;;  %s729_s2 = smov [#allocation7]  }
  0x27   :  { %s444_s29 = sshll.u32 %s729_s2, 4  ;;  %s445_s29 = int_to_ptr.vmem [resolvable:$true] %s444_s29 }
  0x28   :  { %s674_s6 = scalar_lea.vmem %s445_s29, 1024  ;;  %p679_p11 = scmp.lt.s32.totalorder %s445_s29, %s445_s29 }
  0x29   :  { %212 = vmatpush1.bf16.msra.mxu0 %v610_v6  ;;  %587 = vmatpush1.bf16.msra.mxu1 %v610_v6  ;;  %p675_p10 = scmp.ne.s32.totalorder %s445_s29, %s674_s6  ;;  %p680_p12 = scmp.lt.s32.totalorder %s674_s6, %s674_s6 }
  0x2a   :  { %213 = vmatprep.subr.bf16.mxu0 %v611_v7  ;;  %580 = vmatprep.subr.bf16.mxu1 %v611_v7 }
  0x2b   :  { %p681_p13 = por %p680_p12, %p679_p11 }
  0x2d   :  { %214 = vmatpush1.bf16.msra.mxu0 %v613_v8  ;;  %588 = vmatpush1.bf16.msra.mxu1 %v613_v8  ;;  %p682_p0 = pnand %p681_p13, %p675_p10 }
  0x2e   :  { %215 = vmatprep.subr.bf16.mxu0 %v614_v9  ;;  %581 = vmatprep.subr.bf16.mxu1 %v614_v9 }
  0x31   :  { %216 = vmatpush1.bf16.msra.mxu0 %v616_v10  ;;  %589 = vmatpush1.bf16.msra.mxu1 %v616_v10 }
  0x32   :  { %217 = vmatprep.subr.bf16.mxu0 %v617_v11  ;;  %582 = vmatprep.subr.bf16.mxu1 %v617_v11 }
  0x35   :  { %218 = vmatpush1.bf16.msra.mxu0 %v619_v12  ;;  %590 = vmatpush1.bf16.msra.mxu1 %v619_v12 }
  0x36   :  { %219 = vmatprep.subr.bf16.mxu0 %v620_v13  ;;  %583 = vmatprep.subr.bf16.mxu1 %v620_v13 }
  0x39   :  { %220 = vmatpush1.bf16.msra.mxu0 %v622_v14  ;;  %591 = vmatpush1.bf16.msra.mxu1 %v622_v14 }
  0x3a   :  { %221 = vmatprep.subr.bf16.mxu0 %v623_v15  ;;  %584 = vmatprep.subr.bf16.mxu1 %v623_v15 }
  0x3d   :  { %222 = vmatpush1.bf16.msra.mxu0 %v625_v16  ;;  %592 = vmatpush1.bf16.msra.mxu1 %v625_v16 }
  0x40   :  { %240 = vmatmul.mubr.bf16.vlgmr.msra.gmra.mxu0 %v626_v17  ;;  %280 = vmatmul.mubr.bf16.vlgmr.msra.gmra.mxu1 %v627_v18 }
  0x41   :  { %249 = vmatprep.mubr.bf16.mxu0 %v728_v0  ;;  %289 = vmatprep.mubr.bf16.mxu1 %v728_v0 }
  0x48   :  { %250 = vmatmul.mubr.bf16.gmra.mxu0 %v628_v19  ;;  %290 = vmatmul.mubr.bf16.gmra.mxu1 %v629_v20 }
  0x49   :  { %259 = vmatprep.mubr.bf16.mxu0 %v728_v0  ;;  %299 = vmatprep.mubr.bf16.mxu1 %v728_v0 }
  0x50   :  { %260 = vmatmul.mubr.bf16.gmra.mxu0 %v630_v21  ;;  %300 = vmatmul.mubr.bf16.gmra.mxu1 %v631_v22 }
  0x51   :  { %269 = vmatprep.mubr.bf16.mxu0 %v728_v0  ;;  %309 = vmatprep.mubr.bf16.mxu1 %v728_v0 }
  0x58   :  { %270 = vmatmul.mubr.bf16.gmra.mxu0 %v632_v23  ;;  %310 = vmatmul.mubr.bf16.gmra.mxu1 %v633_v24 }
 0x100   :  { %v241_v25 = vpop.f32.mrf.mxu0  ;;  %v281_v26 = vpop.f32.mrf.mxu1 }
 0x102   :  { %v243_v28 = vpop.f32.mrf.mxu0  ;;  %v283_v29 = vpop.f32.mrf.mxu1 }
 0x103   :  { %v407_v30 = vadd.f32 %v779_v27, %v243_v28  ;;  %v415_v31 = vadd.f32 %v779_v27, %v283_v29 }
 0x104   :  { %v245_v32 = vpop.f32.mrf.mxu0  ;;  %v285_v33 = vpop.f32.mrf.mxu1 }
 0x105   :  { %423 = vst [vmem:[#allocation8] sm:$0xff] %v407_v30  ;;  %431 = vst [vmem:[#allocation8 + $0x40] sm:$0xff] %v415_v31  ;;  %v533_v34 = vpack.c.bf16 %v245_v32, %v241_v25  ;;  %v553_v35 = vpack.c.bf16 %v285_v33, %v281_v26 }
 0x106   :  { %v247_v36 = vpop.f32.mrf.mxu0  ;;  %v287_v37 = vpop.f32.mrf.mxu1 }
 0x107   :  { %534 = vst [vmem:[#allocation7] sm:$0xff] %v533_v34   ;;  %573 = vst [vmem:[#allocation7 + $0x20] sm:$0xff] %v553_v35   ;;  %v408_v38 = vadd.f32 %v779_v27, %v247_v36  ;;  %v416_v39 = vadd.f32 %v779_v27, %v287_v37 }
 0x108   :  { %v251_v40 = vpop.f32.mrf.mxu0  ;;  %v291_v41 = vpop.f32.mrf.mxu1 }
 0x109   :  { %424 = vst [vmem:[#allocation8 + $0x8] sm:$0xff] %v408_v38  ;;  %432 = vst [vmem:[#allocation8 + $0x48] sm:$0xff] %v416_v39 }
 0x10a   :  { %v253_v42 = vpop.f32.mrf.mxu0  ;;  %v293_v43 = vpop.f32.mrf.mxu1 }
 0x10b   :  { %v409_v44 = vadd.f32 %v779_v27, %v253_v42  ;;  %v417_v45 = vadd.f32 %v779_v27, %v293_v43 }
 0x10c   :  { %v255_v46 = vpop.f32.mrf.mxu0  ;;  %v295_v47 = vpop.f32.mrf.mxu1 }
 0x10d   :  { %425 = vst [vmem:[#allocation8 + $0x10] sm:$0xff] %v409_v44  ;;  %433 = vst [vmem:[#allocation8 + $0x50] sm:$0xff] %v417_v45  ;;  %v538_v48 = vpack.c.bf16 %v255_v46, %v251_v40  ;;  %v558_v49 = vpack.c.bf16 %v295_v47, %v291_v41 }
 0x10e   :  { %v257_v50 = vpop.f32.mrf.mxu0  ;;  %v297_v51 = vpop.f32.mrf.mxu1 }
 0x10f   :  { %570 = vst [vmem:[#allocation7 + $0x8] sm:$0xff] %v538_v48   ;;  %574 = vst [vmem:[#allocation7 + $0x28] sm:$0xff] %v558_v49   ;;  %v410_v52 = vadd.f32 %v779_v27, %v257_v50  ;;  %v418_v53 = vadd.f32 %v779_v27, %v297_v51 }
 0x110   :  { %v261_v54 = vpop.f32.mrf.mxu0  ;;  %v301_v55 = vpop.f32.mrf.mxu1 }
 0x111   :  { %426 = vst [vmem:[#allocation8 + $0x18] sm:$0xff] %v410_v52  ;;  %434 = vst [vmem:[#allocation8 + $0x58] sm:$0xff] %v418_v53 }
 0x112   :  { %v263_v56 = vpop.f32.mrf.mxu0  ;;  %v303_v57 = vpop.f32.mrf.mxu1 }
 0x113   :  { %v411_v58 = vadd.f32 %v779_v27, %v263_v56  ;;  %v419_v59 = vadd.f32 %v779_v27, %v303_v57 }
 0x114   :  { %v265_v60 = vpop.f32.mrf.mxu0  ;;  %v305_v61 = vpop.f32.mrf.mxu1 }
 0x115   :  { %427 = vst [vmem:[#allocation8 + $0x20] sm:$0xff] %v411_v58  ;;  %435 = vst [vmem:[#allocation8 + $0x60] sm:$0xff] %v419_v59  ;;  %v543_v62 = vpack.c.bf16 %v265_v60, %v261_v54  ;;  %v563_v63 = vpack.c.bf16 %v305_v61, %v301_v55 }
 0x116   :  { %v267_v0 = vpop.f32.mrf.mxu0  ;;  %v307_v1 = vpop.f32.mrf.mxu1 }
 0x117   :  { %571 = vst [vmem:[#allocation7 + $0x10] sm:$0xff] %v543_v62   ;;  %575 = vst [vmem:[#allocation7 + $0x30] sm:$0xff] %v563_v63   ;;  %v412_v2 = vadd.f32 %v779_v27, %v267_v0  ;;  %v420_v3 = vadd.f32 %v779_v27, %v307_v1 }
 0x118   :  { %v271_v4 = vpop.f32.mrf.mxu0  ;;  %v311_v5 = vpop.f32.mrf.mxu1 }
 0x119   :  { %428 = vst [vmem:[#allocation8 + $0x28] sm:$0xff] %v412_v2  ;;  %436 = vst [vmem:[#allocation8 + $0x68] sm:$0xff] %v420_v3 }
 0x11a   :  { %v273_v6 = vpop.f32.mrf.mxu0  ;;  %v313_v7 = vpop.f32.mrf.mxu1 }
 0x11b   :  { %v413_v8 = vadd.f32 %v779_v27, %v273_v6  ;;  %v421_v9 = vadd.f32 %v779_v27, %v313_v7 }
 0x11c   :  { %v275_v10 = vpop.f32.mrf.mxu0  ;;  %v315_v11 = vpop.f32.mrf.mxu1 }
 0x11d   :  { %429 = vst [vmem:[#allocation8 + $0x30] sm:$0xff] %v413_v8  ;;  %437 = vst [vmem:[#allocation8 + $0x70] sm:$0xff] %v421_v9  ;;  %v548_v12 = vpack.c.bf16 %v275_v10, %v271_v4  ;;  %v568_v13 = vpack.c.bf16 %v315_v11, %v311_v5 }
 0x11e   :  { %v277_v14 = vpop.f32.mrf.mxu0  ;;  %v317_v15 = vpop.f32.mrf.mxu1 }
 0x11f   :  { %572 = vst [vmem:[#allocation7 + $0x18] sm:$0xff] %v548_v12   ;;  %576 = vst [vmem:[#allocation7 + $0x38] sm:$0xff] %v568_v13   ;;  %v414_v16 = vadd.f32 %v779_v27, %v277_v14  ;;  %v422_v17 = vadd.f32 %v779_v27, %v317_v15 }
 0x120   :  { %685 = shalt.err (!%p682_p0)
}
 0x121   :  { %450 = dma.vmem_to_hbm [thread:$0]  %s445_s29, 1024, %s812_s3, [#allocation4], %s723_s18, %s723_s18, %s724_s19   ;;  %430 = vst [vmem:[#allocation8 + $0x38] sm:$0xff] %v414_v16  ;;  %438 = vst [vmem:[#allocation8 + $0x78] sm:$0xff] %v422_v17 }
 0x122   :  { %s694_s9 = scalar_lea.vmem %s457_s5, 2048  ;;  %p699_p2 = scmp.lt.s32.totalorder %s457_s5, %s457_s5 }
 0x123   :  { %p695_p1 = scmp.ne.s32.totalorder %s457_s5, %s694_s9  ;;  %p700_p3 = scmp.lt.s32.totalorder %s694_s9, %s694_s9 }
 0x125   :  { %p701_p4 = por %p700_p3, %p699_p2 }
 0x127   :  { %p702_p5 = pnand %p701_p4, %p695_p1 }
 0x129   :  { %705 = shalt.err (!%p702_p5)
}
 0x12a   :  { %462 = dma.vmem_to_hbm [thread:$0]  %s457_s5, 2048, %s813_s4, [#allocation9], %s726_s25, %s726_s25, %s727_s26  }
 0x12b   :  { %718 = dma.done.wait [#allocation4], 1024  }
 0x12c   :  { %719 = vsyncadd [#allocation4], 4294966272 }
 0x12d   :  { %720 = dma.done.wait [#allocation9], 2048  }
 0x12e   :  { %721 = vsyncadd [#allocation9], 4294965248 }
 0x12f   :  { %469 = vsyncpa [#allocation3], 1 }
 0x130   :  { %470 = vsyncpa [#allocation6], 1 }
 0x131   :  { %471 = vsyncpa [#allocation4], 1 }
 0x132   :  { %472 = vsyncpa [#allocation9], 1 }

</bundles_post_ra>
